<compile_context>
chip_gen: v7x
topology: tpu7x:2x2x1
jax: 0.10.0
libtpu: 0.0.40
codegen_flags: <defaults>
</compile_context>

<pallas_src>
import functools

import jax
import jax.numpy as jnp
from jax import lax
from jax.experimental import pallas as pl
from jax.experimental.pallas import tpu as pltpu


def _cdiv(a, b):
    return (a + b - 1) // b


def _round_up(a, b):
    return _cdiv(a, b) * b


def _vmem_limit_bytes():
    """Per-generation scoped VMEM limit (v7x has 64 MiB/TC, v5e/v6e 128 MiB)."""
    phys = 128 * 1024 * 1024
    try:
        phys = int(getattr(pltpu.get_tpu_info(), "vmem_capacity_bytes", phys))
    except Exception:
        pass
    if phys <= 64 * 1024 * 1024:       # v7x-class TensorCore
        return 40 * 1024 * 1024
    return 96 * 1024 * 1024            # v5e / v6e (128 MiB physical)


def _pick_tm_cap(c, in_itemsize, vmem_limit):
    """Largest TM (samples per block) that fits the per-generation VMEM budget."""
    lane_c = _round_up(c, 128)         # lane-padded natural-layout input tile
    sub_c = _round_up(c, 8)            # sublane-padded transposed tile / temporaries
    per_lane_bytes = (
        2 * lane_c * in_itemsize       # double-buffered (TM, C) logits blocks
        + 2 * 8 * 4                    # double-buffered (1, TM) int32 target blocks
        + 6 * sub_c * 4                # transposed tile + f32 temporaries (estimate)
        + 2 * 8 * 4                    # accumulator + per-sample loss rows
    )
    budget = int(vmem_limit * 0.6)     # headroom for compiler-internal scratch
    tm = (budget // per_lane_bytes) // 128 * 128
    return int(max(128, min(tm, 65536)))


def _ce_kernel(logits_ref, tgt_ref, out_ref, acc_ref, *, n_valid, blocks_per_core, tm):
    p = pl.program_id(0)   # core-split index ("parallel")
    i = pl.program_id(1)   # N-tile index ("arbitrary", reduction axis)

    @pl.when(i == 0)
    def _():
        acc_ref[...] = jnp.zeros_like(acc_ref)

    # Natural-layout (TM, C) tile straight from HBM; relayout to (C, TM) on the
    # idle XLU so samples sit on the 128-lane axis for all subsequent math.
    x = logits_ref[...]                                     # (TM, C), native dtype
    xt = x.T                                                # (C, TM)
    c = xt.shape[0]
    tgt = tgt_ref[...]                                      # (1, TM) int32

    # Numerically-stable cross entropy in one fused pass over the tile:
    #   loss_j = log(sum_c exp(x_cj - m_j)) - (x_{t_j, j} - m_j)
    m = jnp.max(xt, axis=0, keepdims=True)                  # (1, TM), native dtype
    shifted = (xt - m).astype(jnp.float32)                  # f32 for exp/log
    classes = lax.broadcasted_iota(jnp.int32, (c, tm), 0)   # (C, TM)
    onehot = classes == tgt                                 # (C, TM)
    sumexp = jnp.sum(jnp.exp(shifted), axis=0, keepdims=True)               # (1, TM)
    picked = jnp.sum(jnp.where(onehot, shifted, 0.0), axis=0, keepdims=True)
    per_sample = jnp.log(sumexp) - picked                                   # (1, TM)

    # Mask ragged / duplicated (index-clamped) blocks by global sample index.
    # TODO(synk): int32 global index overflows past 2^31 samples.
    lane = lax.broadcasted_iota(jnp.int32, (1, tm), 1)
    gidx = (p * blocks_per_core + i) * tm + lane
    acc_ref[...] += jnp.where(gidx < n_valid, per_sample, 0.0)

    @pl.when(i == pl.num_programs(1) - 1)
    def _():
        partial = jnp.sum(acc_ref[...])                     # one cross-lane reduce per core
        out_ref[...] = jnp.broadcast_to(partial, out_ref.shape).astype(out_ref.dtype)


def cross_entropy_loss(inputs, targets, num_labels=10):
    """Pallas equivalent of CrossEntropyLoss.forward(input, target) (mean reduction)."""
    c = num_labels
    logits = inputs.reshape(-1, c)                 # (N, C) natural layout, no copy
    n = logits.shape[0]
    tgt = targets.reshape(1, -1).astype(jnp.int32) # (1, N): lane-dense target blocks

    num_cores = 2  # leading "parallel" axis: 2x on v7x megacore, harmless loop on v5e/v6e
    vmem_limit = _vmem_limit_bytes()
    tm_cap = _pick_tm_cap(c, logits.dtype.itemsize, vmem_limit)

    # Fit TM to N: enough blocks to respect the VMEM cap, rounded to a multiple
    # of num_cores, so ragged-block waste is <= one 128-row round-up per block.
    total_blocks = _round_up(max(num_cores, _cdiv(n, tm_cap)), num_cores)
    tm = _round_up(_cdiv(n, total_blocks), 128)
    blocks_per_core = total_blocks // num_cores
    last_block = max(_cdiv(n, tm) - 1, 0)

    def logits_map(p, i):
        # Clamp so fully-out-of-range blocks (tiny N) re-read a valid block;
        # their contribution is zeroed by the gidx mask inside the kernel.
        return (jnp.minimum(p * blocks_per_core + i, last_block), 0)

    def tgt_map(p, i):
        return (0, jnp.minimum(p * blocks_per_core + i, last_block))

    kernel = functools.partial(
        _ce_kernel, n_valid=n, blocks_per_core=blocks_per_core, tm=tm)

    partials = pl.pallas_call(
        kernel,
        out_shape=jax.ShapeDtypeStruct((num_cores, 8, 128), jnp.float32),
        grid_spec=pltpu.PrefetchScalarGridSpec(
            num_scalar_prefetch=0,
            grid=(num_cores, blocks_per_core),
            in_specs=[
                pl.BlockSpec((tm, c), logits_map),     # natural (TM, C) blocks
                pl.BlockSpec((1, tm), tgt_map),        # lane-dense targets
            ],
            out_specs=pl.BlockSpec((1, 8, 128), lambda p, i: (p, 0, 0)),
            scratch_shapes=[pltpu.VMEM((1, tm), jnp.float32)],
        ),
        compiler_params=pltpu.CompilerParams(
            # TODO(synk): on v7x verify "parallel" actually shards the leading
            # axis across both TensorCores; if profiling shows it does not,
            # switch that axis to pltpu.CORE_PARALLEL.
            dimension_semantics=("parallel", "arbitrary"),
            vmem_limit_bytes=vmem_limit,
        ),
    )(logits, tgt)

    # TODO(synk): PyTorch's default ignore_index=-100, class weights and
    # reduction='sum'/'none' are not implemented; only the default mean path
    # with in-range targets is reproduced.
    # TODO(synk): for LM-head-sized num_labels add a class-tile grid axis with
    # an online-logsumexp accumulator; here TM simply shrinks with C.
    return jnp.sum(partials[:, 0, 0]) / jnp.float32(n)


if __name__ == "__main__":
    num_labels = 10
    key = jax.random.PRNGKey(0)
    k_in, k_tgt = jax.random.split(key)

    # Small shapes consistent with the module: input views to (-1, num_labels).
    x = jax.random.normal(k_in, (2, 4, num_labels), dtype=jnp.float32)   # -> (8, 10)
    target = jax.random.randint(k_tgt, (8,), 0, num_labels, dtype=jnp.int32)

    loss = cross_entropy_loss(x, target, num_labels=num_labels)
    jax.block_until_ready(loss)

    # Reference check against plain-JAX cross entropy.
    logits = x.reshape(-1, num_labels).astype(jnp.float32)
    ref = jnp.mean(
        jax.nn.logsumexp(logits, axis=-1)
        - jnp.take_along_axis(logits, target[:, None], axis=-1)[:, 0]
    )
    assert jnp.allclose(loss, ref, atol=1e-5, rtol=1e-5), (loss, ref)

    print("KERNEL_OK")
</pallas_src>

<mosaic_0001>
module attributes {stable_mosaic.version = 11 : i64} {
  func.func @_ce_kernel(%arg0: i32, %arg1: i32, %arg2: memref<128x10xf32, #tpu.memory_space<vmem>>, %arg3: memref<1x128xi32, #tpu.memory_space<vmem>>, %arg4: memref<1x8x128xf32, #tpu.memory_space<vmem>>, %arg5: memref<1x128xf32, #tpu.memory_space<vmem>>) attributes {dimension_semantics = [#tpu.dimension_semantics<parallel>, #tpu.dimension_semantics<arbitrary>], iteration_bounds = array<i64: 2, 1>, scalar_prefetch = 0 : i64, scratch_operands = 1 : i64, tpu.core_type = #tpu.core_type<tc>, window_params = [{transform_indices = @transform_0, window_bounds = array<i64: 128, 10>}, {transform_indices = @transform_1, window_bounds = array<i64: 1, 128>}, {transform_indices = @transform_2, window_bounds = array<i64: 1, 8, 128>}]} {
    %c0_i32 = arith.constant 0 : i32
    %0 = arith.cmpi eq, %arg1, %c0_i32 : i32
    %1 = arith.extui %0 : i1 to i32
    %c0_i32_0 = arith.constant 0 : i32
    %2 = arith.cmpi ne, %1, %c0_i32_0 : i32
    scf.if %2 {
      %cst_14 = arith.constant 0.000000e+00 : f32
      %38 = vector.broadcast %cst_14 : f32 to vector<1x128xf32>
      %c0_15 = arith.constant 0 : index
      %c0_16 = arith.constant 0 : index
      %39 = vector.load %arg5[%c0_15, %c0_16] : memref<1x128xf32, #tpu.memory_space<vmem>>, vector<1x128xf32>
      tpu.vector_store %arg5[%c0_15, %c0_16], %38 {strides = array<i32>} : memref<1x128xf32, #tpu.memory_space<vmem>>, vector<1x128xf32>,
    } else {
    }
    %c0 = arith.constant 0 : index
    %c0_1 = arith.constant 0 : index
    %3 = vector.load %arg2[%c0, %c0_1] : memref<128x10xf32, #tpu.memory_space<vmem>>, vector<128x10xf32>
    %4 = tpu.transpose %3, [1, 0] : vector<128x10xf32> -> vector<10x128xf32>
    %c0_2 = arith.constant 0 : index
    %c0_3 = arith.constant 0 : index
    %5 = vector.load %arg3[%c0_2, %c0_3] : memref<1x128xi32, #tpu.memory_space<vmem>>, vector<1x128xi32>
    %cst = arith.constant dense<0xFF800000> : vector<128xf32>
    %6 = vector.multi_reduction <maximumf>, %4, %cst [0] : vector<10x128xf32> to vector<128xf32>
    %7 = vector.shape_cast %6 : vector<128xf32> to vector<1x128xf32>
    %8 = vector.broadcast %7 : vector<1x128xf32> to vector<10x128xf32>
    %9 = arith.subf %4, %8 : vector<10x128xf32>
    %10 = tpu.iota {dimensions = array<i32: 0>} : vector<10x128xi32>
    %11 = vector.broadcast %5 : vector<1x128xi32> to vector<10x128xi32>
    %12 = arith.cmpi eq, %10, %11 : vector<10x128xi32>
    %13 = math.exp %9 : vector<10x128xf32>
    %cst_4 = arith.constant dense<0.000000e+00> : vector<128xf32>
    %14 = vector.multi_reduction <add>, %13, %cst_4 [0] : vector<10x128xf32> to vector<128xf32>
    %15 = vector.shape_cast %14 : vector<128xf32> to vector<1x128xf32>
    %cst_5 = arith.constant 0.000000e+00 : f32
    %16 = vector.broadcast %cst_5 : f32 to vector<10x128xf32>
    %17 = arith.select %12, %9, %16 : vector<10x128xi1>, vector<10x128xf32>
    %cst_6 = arith.constant dense<0.000000e+00> : vector<128xf32>
    %18 = vector.multi_reduction <add>, %17, %cst_6 [0] : vector<10x128xf32> to vector<128xf32>
    %19 = vector.shape_cast %18 : vector<128xf32> to vector<1x128xf32>
    %20 = math.log %15 : vector<1x128xf32>
    %21 = arith.subf %20, %19 : vector<1x128xf32>
    %22 = tpu.iota {dimensions = array<i32: 1>} : vector<1x128xi32>
    %c1_i32 = arith.constant 1 : i32
    %23 = arith.muli %arg0, %c1_i32 : i32
    %24 = arith.addi %23, %arg1 : i32
    %c128_i32 = arith.constant 128 : i32
    %25 = arith.muli %24, %c128_i32 : i32
    %26 = vector.broadcast %25 : i32 to vector<1x128xi32>
    %27 = arith.addi %26, %22 : vector<1x128xi32>
    %c0_7 = arith.constant 0 : index
    %c0_8 = arith.constant 0 : index
    %28 = vector.load %arg5[%c0_7, %c0_8] : memref<1x128xf32, #tpu.memory_space<vmem>>, vector<1x128xf32>
    %c8_i32 = arith.constant 8 : i32
    %29 = vector.broadcast %c8_i32 : i32 to vector<1x128xi32>
    %30 = arith.cmpi slt, %27, %29 : vector<1x128xi32>
    %cst_9 = arith.constant 0.000000e+00 : f32
    %31 = vector.broadcast %cst_9 : f32 to vector<1x128xf32>
    %32 = arith.select %30, %21, %31 : vector<1x128xi1>, vector<1x128xf32>
    %33 = arith.addf %28, %32 : vector<1x128xf32>
    %c0_10 = arith.constant 0 : index
    %c0_11 = arith.constant 0 : index
    %34 = vector.load %arg5[%c0_10, %c0_11] : memref<1x128xf32, #tpu.memory_space<vmem>>, vector<1x128xf32>
    tpu.vector_store %arg5[%c0_10, %c0_11], %33 {strides = array<i32>} : memref<1x128xf32, #tpu.memory_space<vmem>>, vector<1x128xf32>,
    %c0_i32_12 = arith.constant 0 : i32
    %35 = arith.cmpi eq, %arg1, %c0_i32_12 : i32
    %36 = arith.extui %35 : i1 to i32
    %c0_i32_13 = arith.constant 0 : i32
    %37 = arith.cmpi ne, %36, %c0_i32_13 : i32
    scf.if %37 {
      %c0_14 = arith.constant 0 : index
      %c0_15 = arith.constant 0 : index
      %38 = vector.load %arg5[%c0_14, %c0_15] : memref<1x128xf32, #tpu.memory_space<vmem>>, vector<1x128xf32>
      %39 = vector.shape_cast %38 : vector<1x128xf32> to vector<1x1x128xf32>
      %cst_16 = arith.constant dense<0.000000e+00> : vector<1xf32>
      %40 = vector.multi_reduction <add>, %39, %cst_16 [1, 2] : vector<1x1x128xf32> to vector<1xf32>
      %41 = vector.shape_cast %40 : vector<1xf32> to vector<1x1x1xf32>
      %42 = vector.extract %41[0, 0, 0] : f32 from vector<1x1x1xf32>
      %43 = vector.broadcast %42 : f32 to vector<1x8x128xf32>
      %c0_17 = arith.constant 0 : index
      %c0_18 = arith.constant 0 : index
      %c0_19 = arith.constant 0 : index
      %44 = vector.load %arg4[%c0_17, %c0_18, %c0_19] : memref<1x8x128xf32, #tpu.memory_space<vmem>>, vector<1x8x128xf32>
      tpu.vector_store %arg4[%c0_17, %c0_18, %c0_19], %43 {strides = array<i32>} : memref<1x8x128xf32, #tpu.memory_space<vmem>>, vector<1x8x128xf32>,
    } else {
    }
    return
  }
  func.func @transform_0(%arg0: i32, %arg1: i32) -> (i32, i32) {
    %c1_i32 = arith.constant 1 : i32
    %0 = arith.muli %arg0, %c1_i32 : i32
    %1 = arith.addi %0, %arg1 : i32
    %c0_i32 = arith.constant 0 : i32
    %2 = arith.minsi %1, %c0_i32 : i32
    %c0_i32_0 = arith.constant 0 : i32
    %c0_i32_1 = arith.constant 0 : i32
    return %2, %c0_i32_0 : i32, i32
  }
  func.func @transform_1(%arg0: i32, %arg1: i32) -> (i32, i32) {
    %c1_i32 = arith.constant 1 : i32
    %0 = arith.muli %arg0, %c1_i32 : i32
    %1 = arith.addi %0, %arg1 : i32
    %c0_i32 = arith.constant 0 : i32
    %2 = arith.minsi %1, %c0_i32 : i32
    %c0_i32_0 = arith.constant 0 : i32
    %c0_i32_1 = arith.constant 0 : i32
    return %c0_i32_0, %2 : i32, i32
  }
  func.func @transform_2(%arg0: i32, %arg1: i32) -> (i32, i32, i32) {
    %c0_i32 = arith.constant 0 : i32
    %c0_i32_0 = arith.constant 0 : i32
    %c0_i32_1 = arith.constant 0 : i32
    return %arg0, %c0_i32, %c0_i32_0 : i32, i32, i32
  }
}

</mosaic_0001>

<bundles_post_ra>
// kernel: tpu_custom_call.1
= control target key start
LH: loop header
LB: loop body
LE: loop exit
PB: predicated region body
PF: predicated region fallthrough
CT: control target
= control target key end

     0   :  { %7 = vsyncpa [#allocation4], 0  ;;  %s990_s0 = inlined_call_operand.hbm [shape: f32[8,10], index: 0, kind: input, shape index: {}]   ;;  %s991_s1 = inlined_call_operand.hbm [shape: s32[1,8], index: 1, kind: input, shape index: {}]   ;;  %s992_s2 = inlined_call_operand.hbm [shape: f32[2,8,128], index: 2, kind: output, shape index: {}]  }
   0x1   :  { %9 = vsyncpa [#allocation4 + $0x1], 0 }
   0x2   :  { %10 = vsyncpa [#allocation7], 0 }
   0x3   :  { %12 = vsyncpa [#allocation7 + $0x1], 0 }
   0x4   :  { %13 = vsyncpa [#allocation5], 0 }
   0x5   :  { %15 = vsyncpa [#allocation5 + $0x1], 0  ;;  %s781_s9 = smov 0   ;;  %s783_s10 = smov 0  }
   0x6   :  { %s785_s11 = smov 0   ;;  %s787_s12 = smov 0  }
   0x7   :  { %s789_s13 = smov 0   ;;  %s791_s14 = smov 0  }
   0x8   :  { %s793_s15 = smov 0   ;;  %s795_s16 = smov 0  }
   0x9 LB: > { %s478_s17 = sadd.s32 4294967295, %s758_s16   ;;  %s479_s18 = sadd.s32 4294967294, %s758_s16   ;;  %s758_s16 = sphi %s795_s16, %s21_s16   ;;  %s754_s15 = sphi %s793_s15, %s1009_s15   ;;  %s750_s14 = sphi %s791_s14, %s1008_s14   ;;  %s746_s13 = sphi %s789_s13, %s980_s13   ;;  %s742_s12 = sphi %s787_s12, %s1007_s12   ;;  %s738_s11 = sphi %s785_s11, %s1006_s11   ;;  %s734_s10 = sphi %s783_s10, %s1005_s10   ;;  %s730_s9 = sphi %s781_s9, %s1004_s9  }
   0xa   : > { %s33_s19 = sadd.s32 1, %s754_s15  ;;  %p727_p1 = scmp.ne.s32.totalorder %s746_s13, 0 }
   0xb   : > { %p35_p0 = scmp.ge.s32.totalorder %s33_s19, 2  ;;  %p54_p2 = scmp.eq.s32.totalorder %s758_s16, 0 }
   0xc   : > { %p59_p3 = scmp.ne.s32.totalorder %s746_s13, %s742_s12  ;;  %p60_p5 = scmp.eq.s32.totalorder %s478_s17, 0 }
   0xd   : > { %s1011_s19 = smov (%p35_p0, %s33_s19), 0  ;;  %p827_p4 = por %p727_p1, %p54_p2 }
   0xe   : > { %p831_p6 = por %p60_p5, %p59_p3  ;;  %s101_s22 = ssub.s32 %s754_s15, %s1011_s19 }
   0xf   : > { %p102_p7 = scmp.eq.s32.totalorder %s101_s22, 0  ;;  %s104_s23 = sadd.s32 1, %s738_s11 }
  0x10   : > { %s997_s21 = scalar_select %p831_p6, 1, 0 }
  0x11   : > { %s839_s24 = scalar_select %p102_p7, %s738_s11, %s104_s23  }
  0x12   : > { %p114_p8 = scmp.ne.s32.totalorder %s738_s11, %s734_s10  ;;  %p115_p9 = scmp.eq.s32.totalorder %s478_s17, 1 }
  0x13   : > { %p120_p10 = scmp.ne.s32.totalorder %s734_s10, %s730_s9  ;;  %p121_p11 = scmp.eq.s32.totalorder %s479_s18, 1 }
  0x14   : > { %p845_p12 = por %p115_p9, %p114_p8  ;;  %p993_p0 = scmp.ge.s32.totalorder %s758_s16, 2 }
  0x15   : > { %p849_p13 = por %p121_p11, %p120_p10 }
  0x16   : > { %s998_s25 = scalar_select %p845_p12, 1, 0 }
  0x17   : > { %s999_s26 = scalar_select %p849_p13, 1, 0 }
  0x18   : > { %137 = sbr.rel (%p993_p0) target bundleno = 79 (0x4f), region = 16 }
  0x1f   : > { %140 = sbr.rel (!%p827_p4) target bundleno = 58 (0x3a), region = 20 }
  0x26   : > { %154 = vsyncadd [#allocation4], 1920  ;;  %s760_s27 = smov [#allocation3]   ;;  %s593_s3 = scalar_lea.hbm %s990_s0, 128 }
  0x27   : > { %s159_s28 = sshll.u32 %s760_s27, 4  ;;  %p594_p1 = scmp.ne.s32.totalorder %s990_s0, %s593_s3  ;;  %s160_s28 = int_to_ptr.vmem [resolvable:$true] %s159_s28 }
  0x28   : > { %p599_p2 = scmp.lt.u32.totalorder %s593_s3, %s593_s3  ;;  %p601_p3 = scmp.lt.u32.totalorder %s593_s3, %s990_s0 }
  0x2a   : > { %p602_p5 = por %p601_p3, %p599_p2 }
  0x2c   : > { %p603_p7 = pnand %p602_p5, %p594_p1 }
  0x2e   : > { %606 = shalt.err (!%p603_p7)
}
  0x2f   : > { %s607_s8 = scalar_lea.vmem %s160_s28, 128  ;;  %s613_s12 = scalar_lea.vmem %s160_s28, 4096 }
  0x30   : > { %p608_p8 = scmp.ne.s32.totalorder %s160_s28, %s607_s8  ;;  %p614_p9 = scmp.lt.s32.totalorder %s160_s28, %s160_s28 }
  0x31   : > { %p615_p10 = scmp.lt.s32.totalorder %s613_s12, %s607_s8 }
  0x33   : > { %p616_p11 = por %p615_p10, %p614_p9 }
  0x35   : > { %p617_p0 = pnand %p616_p11, %p608_p8 }
  0x37   : > { %620 = shalt.err (!%p617_p0)
}
  0x38   : > { %s761_s17 = smov 128   ;;  %s762_s18 = smov 8  }
  0x39   : > { %165 = dma.hbm_to_vmem [thread:$0]  %s990_s0, 128, %s160_s28, [#allocation4], %s761_s17, %s761_s17, %s762_s18  }
  0x3a PF: > { %s763_s27 = smov [#allocation6]   ;;  %s621_s4 = scalar_lea.hbm %s991_s1, 16 }
  0x3b   : > { %s182_s29 = sshll.u32 %s763_s27, 4  ;;  %p622_p1 = scmp.ne.s32.totalorder %s991_s1, %s621_s4  ;;  %s183_s29 = int_to_ptr.vmem [resolvable:$true] %s182_s29 }
  0x3c   : > { %p627_p3 = scmp.lt.u32.totalorder %s621_s4, %s621_s4  ;;  %p629_p5 = scmp.lt.u32.totalorder %s621_s4, %s991_s1 }
  0x3d   : > { %p623_p0 = pnand %p622_p1, %p827_p4 }
  0x3e   : > { %p630_p7 = por %p629_p5, %p627_p3 }
  0x3f   : > { %p624_p2 = pneg %p623_p0 }
  0x41   : > { %p631_p8 = pnand %p630_p7, %p624_p2 }
  0x43   : > { %634 = shalt.err (!%p631_p8)
}
  0x44   : > { %s635_s28 = scalar_lea.vmem %s183_s29, 16  ;;  %s641_s12 = scalar_lea.vmem %s183_s29, 32 }
  0x45   : > { %p636_p9 = scmp.ne.s32.totalorder %s183_s29, %s635_s28  ;;  %p642_p13 = scmp.lt.s32.totalorder %s183_s29, %s183_s29 }
  0x46   : > { %p643_p12 = scmp.lt.s32.totalorder %s641_s12, %s635_s28 }
  0x47   : > { %p637_p10 = pnand %p636_p9, %p827_p4 }
  0x48   : > { %p644_p6 = por %p643_p12, %p642_p13 }
  0x49   : > { %p638_p11 = pneg %p637_p10 }
  0x4b   : > { %p645_p1 = pnand %p644_p6, %p638_p11 }
  0x4d   : > { %648 = shalt.err (!%p645_p1)
}
  0x4e   : > { %502 = dma.hbm_to_vmem [thread:$0]  (%p827_p4), %s991_s1, 16, %s183_s29, [#allocation7]  }
  0x4f PF: > { %p490_p0 = scmp.ge.s32.totalorder %s758_s16, 1  ;;  %p187_p2 = scmp.lt.s32.totalorder %s758_s16, 3 }
  0x51   : > { %p188_p3 = pnand %p490_p0, %p187_p2 }
  0x52   : > { %s891_s22 = sand.u32 (!%p188_p3), 1, %s746_s13   ;;  %p1000_p6 = scmp.ne.s32.totalorder (!%p188_p3), %s997_s21, 0 }
  0x53   : > { %191 = sbr.rel (%p188_p3) target bundleno = 519 (0x207), region = 28  ;;  %s491_s23 = sshll.u32 (!%p188_p3), %s891_s22, 7 }
  0x54   : > { %s194_s27 = scalar_lea.sflag (!%p188_p3), [#allocation4], %s891_s22  ;;  %s895_s20 = scalar_lea.vmem (!%p188_p3), [#allocation3], %s491_s23 }
  0x5a   : > { %714 = dma.done.wait (%p1000_p6), %s194_s27, 2048  }
  0x5b   : > { %716 = vsyncadd (%p1000_p6), %s194_s27, 4294965248  ;;  %s203_s29 = scalar_lea.sflag [#allocation7], %s891_s22  ;;  %s205_s30 = scalar_lea.vmem [#allocation6], %s891_s22 }
  0x5c   : > { %718 = dma.done.wait (%p1000_p6), %s203_s29, 16  }
  0x5d   : > { %720 = vsyncadd (%p1000_p6), %s203_s29, 4294967280  ;;  %v244_v0 = vld [vmem:[%s895_s20] sm:$0xff]  ;;  %v245_v1 = vld [vmem:[%s895_s20 + $0x8] sm:$0xff]  ;;  %v764_v2 = vmov 0.0   ;;  %vm293_vm0 = vcmask 1041408   ;;  %v304_v26 = vlaneseq  ;;  %s494_s21 = sshll.u32 %s750_s14, 7 }
  0x5e   : > { %260 = vxpose.xlu0.b32.start [1/16] (narrow) %v244_v0, 16  ;;  %243 = vst [vmem:[#allocation2] sm:$0x1] %v764_v2  ;;  %v246_v3 = vld [vmem:[%s895_s20 + $0x10] sm:$0xff]  ;;  %v247_v4 = vld [vmem:[%s895_s20 + $0x18] sm:$0xff]  ;;  %v248_v5 = vld [vmem:[%s895_s20 + $0x20] sm:$0xff]  ;;  %v342_v54 = vstv %s494_s21  ;;  %s939_s12 = scalar_lea.hbm %s992_s2, %s494_s21 }
  0x5f   : > { %v249_v6 = vld [vmem:[%s895_s20 + $0x28] sm:$0xff]  ;;  %v250_v7 = vld [vmem:[%s895_s20 + $0x30] sm:$0xff]  ;;  %v251_v8 = vld [vmem:[%s895_s20 + $0x38] sm:$0xff]  ;;  %v305_v30 = vshrl.u32 %v304_v26, 7  ;;  %v339_v53 = vand.u32 127, %v304_v26  ;;  %vm353_vm4 = vcmask 1040384  }
  0x60   : > { %v252_v9 = vld [vmem:[%s895_s20 + $0x40] sm:$0xff]  ;;  %v253_v10 = vld [vmem:[%s895_s20 + $0x48] sm:$0xff]  ;;  %v254_v11 = vld [vmem:[%s895_s20 + $0x50] sm:$0xff]  ;;  %s227_s3 = sand.u32 1, %s734_s10   ;;  %p1001_p12 = scmp.ne.s32.totalorder %s998_s25, 0 }
  0x61   : > { %v255_v12 = vld [vmem:[%s895_s20 + $0x58] sm:$0xff]  ;;  %v256_v13 = vld [vmem:[%s895_s20 + $0x60] sm:$0xff]  ;;  %v257_v14 = vld [vmem:[%s895_s20 + $0x68] sm:$0xff]  ;;  %v306_v33 = vadd.s32 8, %v305_v30  ;;  %v343_v56 = vadd.s32 %v342_v54, %v339_v53  ;;  %s492_s4 = sshll.u32 %s227_s3, 3  ;;  %s367_s17 = scalar_lea.sflag [#allocation5], %s227_s3 }
  0x62   : > { %261 = vxpose.xlu0.b32.cont [2/16] (narrow) %v245_v1, 16  ;;  %v258_v15 = vld [vmem:[%s895_s20 + $0x70] sm:$0xff]  ;;  %v259_v16 = vld [vmem:[%s895_s20 + $0x78] sm:$0xff]  ;;  %s229_s5 = scalar_lea.vmem [#allocation8], %s492_s4  ;;  %s765_s22 = smov [#allocation8]  }
  0x63   : > { %v493_v34 = vld [vmem:[%s205_s30] ss:$0 sm:$0xff]  ;;  %vm345_vm3 = vcmp.lt.s32.totalorder %v343_v56, 8  ;;  %s380_s6 = sshll.u32 %s229_s5, 4  ;;  %s653_s23 = sshll.u32 %s765_s22, 4  ;;  %s932_s6 = int_to_ptr.vmem [resolvable:$true] %s380_s6  ;;  %s654_s23 = int_to_ptr.vmem [resolvable:$false] %s653_s23 }
  0x64   : > { %vm312_vm1 = vcmp.eq.s32.totalorder %v306_v33, %v493_v34  ;;  %vm311_vm2 = vcmp.eq.s32.totalorder %v305_v30, %v493_v34  ;;  %s649_s18 = scalar_lea.vmem %s932_s6, 128  ;;  %s655_s27 = scalar_lea.vmem %s654_s23, 256 }
  0x65   : > { %v344_v61 = vld [vmem:[#allocation2] sm:$0x1]  ;;  %p650_p4 = scmp.ne.s32.totalorder %s932_s6, %s649_s18  ;;  %p656_p7 = scmp.lt.s32.totalorder %s932_s6, %s654_s23 }
  0x66   : > { %262 = vxpose.xlu0.b32.cont [3/16] (narrow) %v246_v3, 16  ;;  %p657_p8 = scmp.lt.s32.totalorder %s655_s27, %s649_s18 }
  0x67   : > { %p651_p13 = pnand %p650_p4, %p1001_p12 }
  0x68   : > { %p658_p9 = por %p657_p8, %p656_p7 }
  0x69   : > { %p652_p5 = pneg %p651_p13 }
  0x6a   : > { %263 = vxpose.xlu0.b32.cont [4/16] (narrow) %v247_v4, 16 }
  0x6b   : > { %p659_p10 = pnand %p658_p9, %p652_p5 }
  0x6e   : > { %264 = vxpose.xlu0.b32.cont [5/16] (narrow) %v248_v5, 16 }
  0x72   : > { %265 = vxpose.xlu0.b32.cont [6/16] (narrow) %v249_v6, 16 }
  0x76   : > { %266 = vxpose.xlu0.b32.cont [7/16] (narrow) %v250_v7, 16 }
  0x7a   : > { %267 = vxpose.xlu0.b32.cont [8/16] (narrow) %v251_v8, 16 }
  0x7e   : > { %268 = vxpose.xlu0.b32.cont [9/16] (narrow) %v252_v9, 16 }
  0x82   : > { %269 = vxpose.xlu0.b32.cont [10/16] (narrow) %v253_v10, 16 }
  0x86   : > { %270 = vxpose.xlu0.b32.cont [11/16] (narrow) %v254_v11, 16 }
  0x8a   : > { %271 = vxpose.xlu0.b32.cont [12/16] (narrow) %v255_v12, 16 }
  0x8e   : > { %272 = vxpose.xlu0.b32.cont [13/16] (narrow) %v256_v13, 16 }
  0x92   : > { %273 = vxpose.xlu0.b32.cont [14/16] (narrow) %v257_v14, 16 }
  0x96   : > { %274 = vxpose.xlu0.b32.cont [15/16] (narrow) %v258_v15, 16 }
  0x9a   : > { %275 = vxpose.xlu0.b32.end [16/16] (narrow) %v259_v16, 16 }
  0xde   : > { %v276_v17 = vpop.trf.xlu0 }
  0xe2   : > { %v277_v18 = vpop.trf.xlu0 }
  0xe3   : > { %v294_v19 = vsel %vm293_vm0, %v277_v18, -inf }
  0xe4   : > { %v295_v20 = vmax.f32 %v276_v17, %v294_v19 }
  0xe6   : > { %v296_v21 = vrot.slane %v295_v20, 4 }
  0xe8   : > { %v297_v22 = vmax.f32 %v295_v20, %v296_v21 }
  0xea   : > { %v298_v23 = vrot.slane %v297_v22, 2 }
  0xec   : > { %v299_v24 = vmax.f32 %v297_v22, %v298_v23 }
  0xee   : > { %v300_v25 = vrot.slane %v299_v24, 1 }
  0xf0   : > { %v301_v27 = vmax.f32 %v299_v24, %v300_v25 }
  0xf2   : > { %v302_v28 = vsub.f32 %v276_v17, %v301_v27  ;;  %v303_v29 = vsub.f32 %v277_v18, %v301_v27 }
  0xf4   : > { %v313_v31 = vmul.f32 1.442695, %v302_v28  ;;  %v315_v32 = vmul.f32 1.442695, %v303_v29  ;;  %v326_v35 = vsel %vm312_vm1, %v303_v29, 0.0  ;;  %v325_v38 = vsel %vm311_vm2, %v302_v28, 0.0 }
  0xf5   : > { %v327_v39 = vsel %vm293_vm0, %v326_v35, 0.0 }
  0xf6   : > { %587 = vpow2.f32 %v313_v31  ;;  %v328_v42 = vadd.f32 %v327_v39, %v325_v38 }
  0xf7   : > { %589 = vpow2.f32 %v315_v32 }
  0xf8   : > { %v329_v45 = vrot.slane %v328_v42, 4 }
  0xfa   : > { %v330_v48 = vadd.f32 %v329_v45, %v328_v42 }
  0xfc   : > { %v331_v51 = vrot.slane %v330_v48, 2 }
  0xfe   : > { %v332_v52 = vadd.f32 %v331_v51, %v330_v48 }
 0x100   : > { %v588_v36 = vpop.eup %587  ;;  %v333_v55 = vrot.slane %v332_v52, 1 }
 0x101   : > { %v590_v37 = vpop.eup %589 }
 0x102   : > { %v317_v40 = vsel %vm293_vm0, %v590_v37, 0.0  ;;  %v334_v58 = vadd.f32 %v333_v55, %v332_v52 }
 0x103   : > { %v318_v41 = vadd.f32 %v588_v36, %v317_v40 }
 0x105   : > { %v319_v43 = vrot.slane %v318_v41, 4 }
 0x107   : > { %v320_v44 = vadd.f32 %v319_v43, %v318_v41 }
 0x109   : > { %v321_v46 = vrot.slane %v320_v44, 2 }
 0x10b   : > { %v322_v47 = vadd.f32 %v321_v46, %v320_v44 }
 0x10d   : > { %v323_v49 = vrot.slane %v322_v47, 1 }
 0x10f   : > { %v324_v50 = vadd.f32 %v323_v49, %v322_v47 }
 0x111   : > { %591 = vlog2.f32 %v324_v50 }
 0x11b   : > { %v592_v57 = vpop.eup %591 }
 0x11c   : > { %v336_v59 = vmul.f32 0.6931472, %v592_v57 }
 0x11e   : > { %v337_v60 = vsub.f32 %v336_v59, %v334_v58 }
 0x120   : > { %v346_v62 = vsel %vm345_vm3, %v337_v60, 0.0 }
 0x121   : > { %v347_v63 = vadd.f32 %v346_v62, %v344_v61 }
 0x123   : > { %348 = vst [vmem:[#allocation2] sm:$0x1] %v347_v63 }
 0x12a   : > { %v352_v0 = vld [vmem:[#allocation2] sm:$0x1] }
 0x12b   : > { %v354_v1 = vsel %vm353_vm4, %v352_v0, 0.0 }
 0x12c   : > { %355 = vadd.xlane.f32.xlu1 %v354_v1 }
 0x1b9   : > { %v356_v2 = vpop.xlane.xlu1 %355 }
 0x1ba   : > { %v357_v3 = vrot.slane %v356_v2, 4 }
 0x1bc   : > { %v358_v4 = vadd.f32 %v357_v3, %v356_v2 }
 0x1be   : > { %v359_v5 = vrot.slane %v358_v4, 2 }
 0x1c0   : > { %v360_v6 = vadd.f32 %v359_v5, %v358_v4 }
 0x1c2   : > { %v361_v7 = vrot.slane %v360_v6, 1 }
 0x1c4   : > { %v362_v8 = vadd.f32 %v361_v7, %v360_v6 }
 0x1c6   : > { %500 = vpush %v362_v8 }
 0x1f7   : > { %s501_s7 = spop %500 }
 0x1f8   : > { %v364_v9 = vstv %s501_s7 }
 0x1f9   : > { %365 = vst [vmem:[%s229_s5] sm:$0xff] %v364_v9 }
 0x1fa   : > { %662 = shalt.err (!%p659_p10)
}
 0x1fb   : > { %s663_s14 = scalar_lea.hbm %s939_s12, 128  ;;  %s667_s30 = scalar_lea.hbm %s992_s2, 256 }
 0x1fc   : > { %p664_p11 = scmp.ne.s32.totalorder %s939_s12, %s663_s14  ;;  %p668_p2 = scmp.lt.u32.totalorder %s939_s12, %s992_s2 }
 0x1fd   : > { %p669_p3 = scmp.lt.u32.totalorder %s667_s30, %s663_s14  ;;  %p671_p4 = scmp.lt.u32.totalorder %s663_s14, %s939_s12 }
 0x1fe   : > { %p665_p1 = pnand %p664_p11, %p1001_p12 }
 0x1ff   : > { %p670_p6 = por %p669_p3, %p668_p2 }
 0x200   : > { %p666_p0 = pneg %p665_p1 }
 0x201   : > { %p672_p13 = por %p671_p4, %p670_p6 }
 0x203   : > { %p673_p5 = pnand %p672_p13, %p666_p0 }
 0x205   : > { %676 = shalt.err (!%p673_p5)
}
 0x206   : > { %505 = dma.vmem_to_hbm [thread:$0]  (%p1001_p12), %s932_s6, 128, %s939_s12, %s367_s17  }
 0x207 PF: > { %s392_s4 = sand.u32 1, %s730_s9   ;;  %p1002_p7 = scmp.ne.s32.totalorder %s999_s26, 0 }
 0x208   : > { %p1003_p8 = scmp.ge.s32.totalorder %s758_s16, 2  ;;  %s393_s5 = scalar_lea.sflag [#allocation5], %s392_s4 }
 0x20a   : > { %p508_p9 = pnand %p1003_p8, %p1002_p7 }
 0x20c   : > { %722 = dma.done.wait (!%p508_p9), %s393_s5, 128  }
 0x20d   : > { %724 = vsyncadd (!%p508_p9), %s393_s5, 4294967168  ;;  %s21_s16 = sadd.s32 1, %s758_s16   ;;  %s1004_s9 = smov %s734_s10 }
 0x20e   : > { %p18_p10 = scmp.ge.s32.totalorder %s21_s16, 4   ;;  %s1005_s10 = smov %s738_s11 }
 0x20f   : > { %s1006_s11 = smov %s839_s24  ;;  %s1007_s12 = smov %s746_s13 }
 0x210   : > { %s980_s13 = smov 0   ;;  %s1008_s14 = smov %s754_s15 }
 0x211   : > { %s1009_s15 = smov %s1011_s19  ;;  %20 = sbr.rel (!%p18_p10) target bundleno = 9 (0x9), region = 94 }
 0x218   :  { %398 = vsyncpa [#allocation4], 1 }
 0x219   :  { %400 = vsyncpa [#allocation4 + $0x1], 1 }
 0x21a   :  { %401 = vsyncpa [#allocation7], 1 }
 0x21b   :  { %403 = vsyncpa [#allocation7 + $0x1], 1 }
 0x21c   :  { %404 = vsyncpa [#allocation5], 1 }
 0x21d   :  { %406 = vsyncpa [#allocation5 + $0x1], 1 }

</bundles_post_ra>
